<compile_context>
chip_gen: v6e
topology: v6e:2x2x1
jax: 0.10.0
libtpu: 0.0.40
codegen_flags: <defaults>
</compile_context>

<pallas_src>
import functools

import jax
import jax.numpy as jnp
from jax.experimental import pallas as pl
from jax.experimental.pallas import tpu as pltpu


def _round_up(v, m):
    return ((v + m - 1) // m) * m


def baseline_fwd_kernel(x_ref, w1_ref, b1_ref, w2_ref, b2_ref, out_ref):
    """Fused MLP forward: (relu(x @ W1 + b1)) @ W2 + b2, biases added in-kernel."""
    h = jnp.dot(x_ref[...], w1_ref[...], preferred_element_type=jnp.float32)
    h = jnp.maximum(h + b1_ref[...], 0.0)                      # (bb, n_hid)
    y = jnp.dot(h, w2_ref[...], preferred_element_type=jnp.float32) + b2_ref[...]
    out_ref[...] = y.astype(out_ref.dtype)                     # (bb, n_out)


@functools.partial(jax.jit, static_argnames=("block_b", "force_pallas"))
def baseline_forward(x, w1, b1, w2, b2, block_b=1024, force_pallas=False):
    """x: (B, n_in). Returns (B, n_out) = fc2(relu(fc1(x)))."""
    B, n_in = x.shape
    n_hid = w1.shape[1]
    n_out = w2.shape[1]

    x = x.astype(jnp.float32)
    w1 = w1.astype(jnp.float32)
    w2 = w2.astype(jnp.float32)
    b1_2d = b1.astype(jnp.float32).reshape(1, n_hid)
    b2_2d = b2.astype(jnp.float32).reshape(1, n_out)

    # Small-batch fast path: pallas launch overhead dominates the tiny MLP.
    if (not force_pallas) and B < 256:
        h = jnp.maximum(x @ w1 + b1_2d, 0.0)
        return h @ w2 + b2_2d

    # Batch tile: big enough to amortize per-step overhead, but at most
    # ceil(B/2) so large batches always produce >= 2 parallel tiles (v7x has
    # two TensorCores sharding the "parallel" grid axis).
    bb = min(block_b, _round_up((B + 1) // 2, 8))
    B_pad = _round_up(B, bb)

    # Pad only the batch dim (at native width n_in) and only when needed; for
    # the common case (B divisible by bb) this is a no-op.
    if B_pad != B:
        x_p = jnp.pad(x, ((0, B_pad - B), (0, 0)))
    else:
        x_p = x

    out = pl.pallas_call(
        baseline_fwd_kernel,
        out_shape=jax.ShapeDtypeStruct((B_pad, n_out), jnp.float32),
        grid=(B_pad // bb,),
        in_specs=[
            pl.BlockSpec((bb, n_in), lambda i: (i, 0)),      # x tile walks the batch
            pl.BlockSpec((n_in, n_hid), lambda i: (0, 0)),   # weights stay resident
            pl.BlockSpec((1, n_hid), lambda i: (0, 0)),
            pl.BlockSpec((n_hid, n_out), lambda i: (0, 0)),
            pl.BlockSpec((1, n_out), lambda i: (0, 0)),
        ],
        out_specs=pl.BlockSpec((bb, n_out), lambda i: (i, 0)),  # narrow (n_out) output
        compiler_params=pltpu.CompilerParams(
            dimension_semantics=("parallel",)),               # shards across TCs on v7x
    )(x_p, w1, b1_2d, w2, b2_2d)

    return out if B_pad == B else out[:B]


def reference_forward(x, w1, b1, w2, b2):
    h = jnp.maximum(x @ w1 + b1, 0.0)
    return h @ w2 + b2


# TODO(synk): train_baseline (MSE loss + optimizer.step) is a training utility,
# not part of the forward pass, and is not implemented as a kernel.

if __name__ == "__main__":
    # GridWorld baseline: small state -> hidden -> scalar value estimate.
    batch, n_input, n_hidden, n_output = 2, 16, 32, 1

    key = jax.random.PRNGKey(0)
    kx, k1, k2, k3, k4, kbig = jax.random.split(key, 6)
    x = jax.random.normal(kx, (batch, n_input), dtype=jnp.float32)
    w1 = jax.random.normal(k1, (n_input, n_hidden), dtype=jnp.float32) * 0.1
    b1 = jax.random.normal(k2, (n_hidden,), dtype=jnp.float32) * 0.1
    w2 = jax.random.normal(k3, (n_hidden, n_output), dtype=jnp.float32) * 0.1
    b2 = jax.random.normal(k4, (n_output,), dtype=jnp.float32) * 0.1

    # Small-shape check of the Pallas kernel itself (forced past the fast path).
    vals = jax.block_until_ready(
        baseline_forward(x, w1, b1, w2, b2, force_pallas=True))
    ref = reference_forward(x, w1, b1, w2, b2)
    assert vals.shape == (batch, n_output)
    assert jnp.allclose(vals, ref, atol=1e-5, rtol=1e-5)

    # Default path at the typical tiny batch (takes the jnp fast path).
    vals_fast = jax.block_until_ready(baseline_forward(x, w1, b1, w2, b2))
    assert vals_fast.shape == (batch, n_output)
    assert jnp.allclose(vals_fast, ref, atol=1e-5, rtol=1e-5)

    # Batched check: 1024 states -> two 512-row parallel tiles, no padding,
    # narrow (bb, 1) output writeback.
    x_big = jax.random.normal(kbig, (1024, n_input), dtype=jnp.float32)
    vals_big = jax.block_until_ready(baseline_forward(x_big, w1, b1, w2, b2))
    ref_big = reference_forward(x_big, w1, b1, w2, b2)
    assert vals_big.shape == (1024, n_output)
    assert jnp.allclose(vals_big, ref_big, atol=1e-4, rtol=1e-4)

    print("KERNEL_OK")
</pallas_src>

<mosaic_0001>
module attributes {stable_mosaic.version = 11 : i64} {
  func.func @baseline_fwd_kernel(%arg0: i32, %arg1: memref<8x16xf32, #tpu.memory_space<vmem>>, %arg2: memref<16x32xf32, #tpu.memory_space<vmem>>, %arg3: memref<1x32xf32, #tpu.memory_space<vmem>>, %arg4: memref<32x1xf32, #tpu.memory_space<vmem>>, %arg5: memref<1x1xf32, #tpu.memory_space<vmem>>, %arg6: memref<8x1xf32, #tpu.memory_space<vmem>>) attributes {dimension_semantics = [#tpu.dimension_semantics<parallel>], iteration_bounds = array<i64: 1>, scalar_prefetch = 0 : i64, scratch_operands = 0 : i64, tpu.core_type = #tpu.core_type<tc>, window_params = [{transform_indices = @transform_0, window_bounds = array<i64: 8, 16>}, {pipeline_mode = #tpu.pipeline_mode<synchronous>, transform_indices = @transform_1, window_bounds = array<i64: 16, 32>}, {pipeline_mode = #tpu.pipeline_mode<synchronous>, transform_indices = @transform_2, window_bounds = array<i64: 1, 32>}, {pipeline_mode = #tpu.pipeline_mode<synchronous>, transform_indices = @transform_3, window_bounds = array<i64: 32, 1>}, {pipeline_mode = #tpu.pipeline_mode<synchronous>, transform_indices = @transform_4, window_bounds = array<i64: 1, 1>}, {transform_indices = @transform_5, window_bounds = array<i64: 8, 1>}]} {
    %c0 = arith.constant 0 : index
    %c0_0 = arith.constant 0 : index
    %0 = vector.load %arg1[%c0, %c0_0] : memref<8x16xf32, #tpu.memory_space<vmem>>, vector<8x16xf32>
    %c0_1 = arith.constant 0 : index
    %c0_2 = arith.constant 0 : index
    %1 = vector.load %arg2[%c0_1, %c0_2] : memref<16x32xf32, #tpu.memory_space<vmem>>, vector<16x32xf32>
    %cst = arith.constant dense<0.000000e+00> : vector<8x32xf32>
    %2 = tpu.matmul %0, %1, %cst {dimension_numbers = #tpu.dot_dimension_numbers<[1], [0], [0], [1], [0, 0, 1, 1], [], []>} : vector<8x16xf32>, vector<16x32xf32>, vector<8x32xf32> -> vector<8x32xf32>
    %c0_3 = arith.constant 0 : index
    %c0_4 = arith.constant 0 : index
    %3 = vector.load %arg3[%c0_3, %c0_4] : memref<1x32xf32, #tpu.memory_space<vmem>>, vector<1x32xf32>
    %4 = vector.broadcast %3 : vector<1x32xf32> to vector<8x32xf32>
    %5 = arith.addf %2, %4 : vector<8x32xf32>
    %cst_5 = arith.constant 0.000000e+00 : f32
    %6 = vector.broadcast %cst_5 : f32 to vector<8x32xf32>
    %7 = arith.maximumf %5, %6 : vector<8x32xf32>
    %c0_6 = arith.constant 0 : index
    %c0_7 = arith.constant 0 : index
    %8 = vector.load %arg4[%c0_6, %c0_7] : memref<32x1xf32, #tpu.memory_space<vmem>>, vector<32x1xf32>
    %cst_8 = arith.constant dense<0.000000e+00> : vector<8x1xf32>
    %9 = tpu.matmul %7, %8, %cst_8 {dimension_numbers = #tpu.dot_dimension_numbers<[1], [0], [0], [1], [0, 0, 1, 1], [], []>} : vector<8x32xf32>, vector<32x1xf32>, vector<8x1xf32> -> vector<8x1xf32>
    %c0_9 = arith.constant 0 : index
    %c0_10 = arith.constant 0 : index
    %10 = vector.load %arg5[%c0_9, %c0_10] : memref<1x1xf32, #tpu.memory_space<vmem>>, vector<1x1xf32>
    %11 = vector.broadcast %10 : vector<1x1xf32> to vector<8x1xf32>
    %12 = arith.addf %9, %11 : vector<8x1xf32>
    %c0_11 = arith.constant 0 : index
    %c0_12 = arith.constant 0 : index
    %13 = vector.load %arg6[%c0_11, %c0_12] : memref<8x1xf32, #tpu.memory_space<vmem>>, vector<8x1xf32>
    tpu.vector_store %arg6[%c0_11, %c0_12], %12 {strides = array<i32>} : memref<8x1xf32, #tpu.memory_space<vmem>>, vector<8x1xf32>,
    return
  }
  func.func @transform_0(%arg0: i32) -> (i32, i32) {
    %c0_i32 = arith.constant 0 : i32
    %c0_i32_0 = arith.constant 0 : i32
    return %arg0, %c0_i32 : i32, i32
  }
  func.func @transform_1(%arg0: i32) -> (i32, i32) {
    %c0_i32 = arith.constant 0 : i32
    %c0_i32_0 = arith.constant 0 : i32
    %c0_i32_1 = arith.constant 0 : i32
    return %c0_i32, %c0_i32_0 : i32, i32
  }
  func.func @transform_2(%arg0: i32) -> (i32, i32) {
    %c0_i32 = arith.constant 0 : i32
    %c0_i32_0 = arith.constant 0 : i32
    %c0_i32_1 = arith.constant 0 : i32
    return %c0_i32, %c0_i32_0 : i32, i32
  }
  func.func @transform_3(%arg0: i32) -> (i32, i32) {
    %c0_i32 = arith.constant 0 : i32
    %c0_i32_0 = arith.constant 0 : i32
    %c0_i32_1 = arith.constant 0 : i32
    return %c0_i32, %c0_i32_0 : i32, i32
  }
  func.func @transform_4(%arg0: i32) -> (i32, i32) {
    %c0_i32 = arith.constant 0 : i32
    %c0_i32_0 = arith.constant 0 : i32
    %c0_i32_1 = arith.constant 0 : i32
    return %c0_i32, %c0_i32_0 : i32, i32
  }
  func.func @transform_5(%arg0: i32) -> (i32, i32) {
    %c0_i32 = arith.constant 0 : i32
    %c0_i32_0 = arith.constant 0 : i32
    return %arg0, %c0_i32 : i32, i32
  }
}

</mosaic_0001>

<bundles_post_ra>
// kernel: baseline_forward.1
= control target key start
LH: loop header
LB: loop body
LE: loop exit
PB: predicated region body
PF: predicated region fallthrough
CT: control target
= control target key end

     0   :  { %v230_v0 = vmov 0.0   ;;  %vm231_vm0 = vmmov 0   ;;  %vm32_vm1 = vcmask 130048   ;;  %vm118_vm2 = vcmask 261120   ;;  %s292_s1 = inlined_call_operand.vmem [shape: f32[16,32], index: 1, kind: input, shape index: {}]   ;;  %s293_s0 = inlined_call_operand.vmem [shape: f32[8,16], index: 0, kind: input, shape index: {}]   ;;  %s294_s3 = inlined_call_operand.vmem [shape: f32[32,1], index: 3, kind: input, shape index: {}]   ;;  %s295_s4 = inlined_call_operand.<no memory space> [shape: f32[1,1], index: 4, kind: input, shape index: {}]   ;;  %s296_s2 = inlined_call_operand.vmem [shape: f32[1,32], index: 2, kind: input, shape index: {}]   ;;  %s297_s5 = inlined_call_operand.vmem [shape: f32[8,1], index: 5, kind: output, shape index: {}]  }
   0x1   :  { %210 = vmatprep.subr.mxu0 %v230_v0  ;;  %v24_v1 = vld [vmem:[%s292_s1 + $0x8] sm:$0xff]  ;;  %v23_v2 = vld [vmem:[%s292_s1] sm:$0xff]  ;;  %214 = vmatprep.mubr.msk.f32.mxu0 %vm231_vm0, %v230_v0  ;;  %v110_v4 = vld [vmem:[%s294_s3 + $0x18] sm:$0xff]  ;;  %v10_v8 = vstv %s295_s4  ;;  %vm192_vm3 = vcmask 7168  }
   0x2   :  { %211 = vmatpush3.msra.mxu0 %v24_v1  ;;  %v22_v3 = vld [vmem:[%s293_s0] sm:$0xff]  ;;  %217 = vmatprep.subr.mxu1 %v230_v0  ;;  %v109_v5 = vld [vmem:[%s294_s3 + $0x10] sm:$0xff]  ;;  %v108_v6 = vld [vmem:[%s294_s3 + $0x8] sm:$0xff]  ;;  %11 = vst [vmem:[#allocation2] sm:$0x1] %v10_v8 }
   0x3   :  { %212 = vmatprep.subr.mxu0 %v230_v0  ;;  %218 = vmatpush3.msra.mxu1 %v110_v4  ;;  %v107_v7 = vld [vmem:[%s294_s3] sm:$0xff] }
   0x4   :  { %213 = vmatpush3.msra.mxu0 %v23_v2  ;;  %219 = vmatprep.subr.mxu1 %v230_v0  ;;  %v198_v9 = vld [vmem:[%s296_s2] ss:$0 sm:$0xff] }
   0x5   :  { %215 = vmatmul.mubr.msk.f32.vlgmr.msra.gmra.mxu0 %vm32_vm1, %v22_v3  ;;  %225 = vmatprep.mubr.msk.f32.mxu1 %vm231_vm0, %v230_v0 }
   0x6   :  { %220 = vmatpush3.msra.mxu1 %v109_v5 }
   0x7   :  { %221 = vmatprep.subr.mxu1 %v230_v0 }
   0x8   :  { %222 = vmatpush3.msra.mxu1 %v108_v6 }
   0x9   :  { %223 = vmatprep.subr.mxu1 %v230_v0  ;;  %v200_v14 = vld [vmem:[#allocation2] ss:$0 sm:$0xff] }
   0xa   :  { %224 = vmatpush3.msra.mxu1 %v107_v7 }
  0xc5   :  { %v102_v10 = vpop.f32.mrf.mxu0 }
  0xc6   :  { %v103_v11 = vadd.f32 %v198_v9, %v102_v10 }
  0xc7   :  { %v216_v12 = vpop.f32.mrf.mxu0 }
  0xc8   :  { %v106_v13 = vmax.f32 %v103_v11, 0.0 }
  0xca   :  { %226 = vmatmul.mubr.msk.f32.vlgmr.msra.gmra.mxu1 %vm118_vm2, %v106_v13 }
 0x18a   :  { %v188_v15 = vpop.f32.mrf.mxu1 }
 0x18b   :  { %v189_v16 = vadd.f32 %v200_v14, %v188_v15 }
 0x18c   :  { %v227_v17 = vpop.f32.mrf.mxu1 }
 0x18d   :  { %193 = vst.msk [vmem:[%s297_s5] sm:$0xff] %vm192_vm3, %v189_v16 }

</bundles_post_ra>
